<compile_context>
chip_gen: v6e
topology: v6e:2x2x1
jax: 0.10.0
libtpu: 0.0.40
codegen_flags: <defaults>
</compile_context>

<pallas_src>
import jax
import jax.numpy as jnp
from jax.experimental import pallas as pl
from jax.experimental.pallas import tpu as pltpu

PACK = 32                  # samples packed per 128-lane row (4 features * 32 = 128 lanes)
IN_F, HID_F, OUT_F = 4, 32, 3
OUT_PAD = 4                # per-sample outputs padded 3 -> 4 so out rows are 128 lanes
TILE_ROWS_DEFAULT = 2048   # packed rows per grid step (= 65536 samples)
VMEM_LIMIT_BYTES = 32 << 20


def _mlp_kernel(x_ref, w1_ref, b1_ref, w2_ref, b2_ref, o_ref):
    # x_ref : (tb, 128)   bf16 -- 32 samples/row, 4 features each (lane-dense)
    # w1_ref: (128, 1024) bf16 -- block-diag of 32 copies of (4, 32)   [resident]
    # b1_ref: (1, 1024)   f32  -- b1 tiled 32x                          [resident]
    # w2_ref: (1024, 128) bf16 -- block-diag of 32 copies of (32, 4)    [resident]
    # b2_ref: (1, 128)    f32  -- b2 (padded to 4) tiled 32x            [resident]
    # o_ref : (tb, 128)   f32  -- 32 samples/row, 4 outputs each (lane 3 is padding)
    h = jnp.dot(x_ref[...], w1_ref[...], preferred_element_type=jnp.float32)
    # Bias add in f32, then bf16 tanh (EUP bf16 on v6e/v7x; Mosaic widens on v5e).
    h = jnp.tanh((h + b1_ref[...]).astype(jnp.bfloat16))
    y = jnp.dot(h, w2_ref[...], preferred_element_type=jnp.float32) + b2_ref[...]
    o_ref[...] = y.astype(o_ref.dtype)


def pack_params(w1, b1, w2, b2):
    """One-time packing (hoist out of the per-call path): block-diagonal bf16 weights
    and dense-tiled f32 biases so 32 samples share one 128-lane row.
    PyTorch Linear stores weights as (out, in); transpose to (in, out) first."""
    w1_t = jnp.asarray(w1, jnp.float32).T                           # (4, 32)
    w2_t = jnp.asarray(w2, jnp.float32).T                           # (32, 3)
    w2_t = jnp.pad(w2_t, ((0, 0), (0, OUT_PAD - OUT_F)))            # (32, 4), zero lane
    eye = jnp.eye(PACK, dtype=jnp.float32)
    # Block-diag zeros are exact in bf16, so the packing structure is unaffected.
    w1_blk = jnp.kron(eye, w1_t).astype(jnp.bfloat16)               # (128, 1024)
    w2_blk = jnp.kron(eye, w2_t).astype(jnp.bfloat16)               # (1024, 128)
    b1_blk = jnp.tile(jnp.asarray(b1, jnp.float32), PACK).reshape(1, -1)   # (1, 1024)
    b2_pad = jnp.pad(jnp.asarray(b2, jnp.float32), (0, OUT_PAD - OUT_F))
    b2_blk = jnp.tile(b2_pad, PACK).reshape(1, -1)                  # (1, 128)
    return w1_blk, b1_blk, w2_blk, b2_blk


def _choose_tiling(batch, tile_rows):
    """Static (trace-time) tiling: pad packed rows only to a multiple of 8, then pick
    the largest sublane-aligned divisor <= tile_rows, capped so the grid has >=2 steps
    (v7x shards the 'parallel' axis across its two TensorCores)."""
    rows = -(-batch // PACK)                 # packed rows needed
    rows_pad = -(-rows // 8) * 8             # <=255 wasted samples, not a full tile
    tb_cap = max(8, (int(tile_rows) // 8) * 8)
    if rows_pad >= 16:
        tb_cap = min(tb_cap, max(8, (rows_pad // 2) // 8 * 8))   # >=2 grid steps
    tb_cap = min(tb_cap, rows_pad)
    tb = 8
    for cand in range(tb_cap, 7, -8):        # largest divisor of rows_pad (Python-only)
        if rows_pad % cand == 0:
            tb = cand
            break
    return rows_pad, tb


def _forward_packed(x, w1_blk, b1_blk, w2_blk, b2_blk, *, tile_rows):
    B = x.shape[0]
    rows_pad, tb = _choose_tiling(B, tile_rows)
    b_pad = rows_pad * PACK

    # bf16 x halves the kernel's input DMA; cast fuses with the (optional) pad in XLA.
    x = jnp.asarray(x, jnp.float32).astype(jnp.bfloat16)
    if b_pad != B:
        x = jnp.pad(x, ((0, b_pad - B), (0, 0)))
    x_packed = x.reshape(rows_pad, PACK * IN_F)              # (rows_pad, 128), free reshape

    grid = (rows_pad // tb,)
    out_packed = pl.pallas_call(
        _mlp_kernel,
        out_shape=jax.ShapeDtypeStruct((rows_pad, PACK * OUT_PAD), jnp.float32),
        grid_spec=pltpu.PrefetchScalarGridSpec(
            num_scalar_prefetch=0,
            grid=grid,
            in_specs=[
                pl.BlockSpec((tb, PACK * IN_F), lambda i: (i, 0)),              # x tile
                pl.BlockSpec((PACK * IN_F, PACK * HID_F), lambda i: (0, 0)),    # W1 (resident)
                pl.BlockSpec((1, PACK * HID_F), lambda i: (0, 0)),              # b1 (resident)
                pl.BlockSpec((PACK * HID_F, PACK * OUT_PAD), lambda i: (0, 0)), # W2 (resident)
                pl.BlockSpec((1, PACK * OUT_PAD), lambda i: (0, 0)),            # b2 (resident)
            ],
            out_specs=pl.BlockSpec((tb, PACK * OUT_PAD), lambda i: (i, 0)),
        ),
        compiler_params=pltpu.CompilerParams(
            dimension_semantics=("parallel",),      # v7x: shard batch across both TCs
            vmem_limit_bytes=VMEM_LIMIT_BYTES,      # room for the tb x 1024 hidden temp
        ),
    )(x_packed, w1_blk, b1_blk, w2_blk, b2_blk)

    # (rows_pad, 128) -> (b_pad, 4) is free; slice off batch padding and the 4th lane.
    return out_packed.reshape(b_pad, OUT_PAD)[:B, :OUT_F]


def make_regression_forward(w1, b1, w2, b2, *, tile_rows=TILE_ROWS_DEFAULT):
    """Pack the weights ONCE and return a jitted forward(x) -> (B, 3)."""
    packed = pack_params(w1, b1, w2, b2)

    @jax.jit
    def forward(x):
        return _forward_packed(x, *packed, tile_rows=tile_rows)

    return forward


def regression_model_forward(x, w1, b1, w2, b2, *, tile_rows=TILE_ROWS_DEFAULT,
                             min_pallas_batch=0):
    """One-shot convenience wrapper (packs weights per call; prefer
    make_regression_forward for repeated use). Matches fc2(tanh(fc1(x)))."""
    if x.shape[0] < min_pallas_batch:
        # Tiny-batch fallback: launch + pad + kron dwarf ~KB of work.
        x = jnp.asarray(x, jnp.float32)
        return jnp.tanh(x @ w1.T + b1) @ w2.T + b2
    return _forward_packed(x, *pack_params(w1, b1, w2, b2), tile_rows=tile_rows)


def _init_params(key):
    # Deterministic synthetic init mirroring nn.Linear shapes (PyTorch (out, in) layout).
    k1, k2, k3, k4 = jax.random.split(key, 4)
    w1 = jax.random.uniform(k1, (HID_F, IN_F), jnp.float32, -0.5, 0.5)
    b1 = jax.random.uniform(k2, (HID_F,), jnp.float32, -0.5, 0.5)
    w2 = jax.random.uniform(k3, (OUT_F, HID_F), jnp.float32, -0.2, 0.2)
    b2 = jax.random.uniform(k4, (OUT_F,), jnp.float32, -0.2, 0.2)
    return w1, b1, w2, b2


def _ref(x, w1, b1, w2, b2):
    return jnp.tanh(x @ w1.T + b1) @ w2.T + b2


def _check(y, yref, name):
    err_max = float(jnp.max(jnp.abs(y - yref)))
    err_mean = float(jnp.mean(jnp.abs(y - yref)))
    # bf16 MXU operands + bf16 tanh: expect ~1e-3..3e-2 max error vs f32 reference.
    assert err_max < 6e-2, f"{name}: max err {err_max}"
    assert err_mean < 1.5e-2, f"{name}: mean err {err_mean}"


if __name__ == "__main__":
    key = jax.random.PRNGKey(0)
    kx, kp = jax.random.split(key)
    w1, b1, w2, b2 = _init_params(kp)

    # Cached-weights, jitted path (pack_params hoisted out of the per-call path).
    forward = make_regression_forward(w1, b1, w2, b2)

    # 1) Small batch: 64 samples -> 8 packed rows, single grid step.
    B1 = 64
    x1 = jax.random.normal(kx, (B1, IN_F), jnp.float32)
    y1 = forward(x1)
    jax.block_until_ready(y1)
    assert y1.shape == (B1, OUT_F)
    _check(y1, _ref(x1, w1, b1, w2, b2), "B=64")

    # 2) Ragged batch (not divisible by 32), tiny tile -> multiple pipelined grid steps.
    B2 = 600
    x2 = jax.random.normal(jax.random.fold_in(kx, 1), (B2, IN_F), jnp.float32)
    y2 = regression_model_forward(x2, w1, b1, w2, b2, tile_rows=8)
    jax.block_until_ready(y2)
    assert y2.shape == (B2, OUT_F)
    _check(y2, _ref(x2, w1, b1, w2, b2), "B=600")

    # 3) Default tiling path: tile auto-capped so the grid has >=2 steps (v7x TC sharding).
    B3 = 2048
    x3 = jax.random.normal(jax.random.fold_in(kx, 2), (B3, IN_F), jnp.float32)
    y3 = forward(x3)
    jax.block_until_ready(y3)
    assert y3.shape == (B3, OUT_F)
    _check(y3, _ref(x3, w1, b1, w2, b2), "B=2048")

    print("KERNEL_OK")
</pallas_src>

<mosaic_0001>
module attributes {stable_mosaic.version = 11 : i64} {
  func.func @_mlp_kernel(%arg0: i32, %arg1: memref<8x128xbf16, #tpu.memory_space<vmem>>, %arg2: memref<128x1024xbf16, #tpu.memory_space<vmem>>, %arg3: memref<1x1024xf32, #tpu.memory_space<vmem>>, %arg4: memref<1024x128xbf16, #tpu.memory_space<vmem>>, %arg5: memref<1x128xf32, #tpu.memory_space<vmem>>, %arg6: memref<8x128xf32, #tpu.memory_space<vmem>>) attributes {dimension_semantics = [#tpu.dimension_semantics<parallel>], iteration_bounds = array<i64: 1>, scalar_prefetch = 0 : i64, scratch_operands = 0 : i64, tpu.core_type = #tpu.core_type<tc>, window_params = [{transform_indices = @transform_0, window_bounds = array<i64: 8, 128>}, {pipeline_mode = #tpu.pipeline_mode<synchronous>, transform_indices = @transform_1, window_bounds = array<i64: 128, 1024>}, {pipeline_mode = #tpu.pipeline_mode<synchronous>, transform_indices = @transform_2, window_bounds = array<i64: 1, 1024>}, {pipeline_mode = #tpu.pipeline_mode<synchronous>, transform_indices = @transform_3, window_bounds = array<i64: 1024, 128>}, {pipeline_mode = #tpu.pipeline_mode<synchronous>, transform_indices = @transform_4, window_bounds = array<i64: 1, 128>}, {transform_indices = @transform_5, window_bounds = array<i64: 8, 128>}]} {
    %c0 = arith.constant 0 : index
    %c0_0 = arith.constant 0 : index
    %0 = vector.load %arg1[%c0, %c0_0] : memref<8x128xbf16, #tpu.memory_space<vmem>>, vector<8x128xbf16>
    %c0_1 = arith.constant 0 : index
    %c0_2 = arith.constant 0 : index
    %1 = vector.load %arg2[%c0_1, %c0_2] : memref<128x1024xbf16, #tpu.memory_space<vmem>>, vector<128x1024xbf16>
    %cst = arith.constant dense<0.000000e+00> : vector<8x1024xf32>
    %2 = tpu.matmul %0, %1, %cst {dimension_numbers = #tpu.dot_dimension_numbers<[1], [0], [0], [1], [0, 0, 1, 1], [], []>} : vector<8x128xbf16>, vector<128x1024xbf16>, vector<8x1024xf32> -> vector<8x1024xf32>
    %c0_3 = arith.constant 0 : index
    %c0_4 = arith.constant 0 : index
    %3 = vector.load %arg3[%c0_3, %c0_4] : memref<1x1024xf32, #tpu.memory_space<vmem>>, vector<1x1024xf32>
    %4 = vector.broadcast %3 : vector<1x1024xf32> to vector<8x1024xf32>
    %5 = arith.addf %2, %4 : vector<8x1024xf32>
    %6 = arith.truncf %5 : vector<8x1024xf32> to vector<8x1024xbf16>
    %7 = math.tanh %6 : vector<8x1024xbf16>
    %c0_5 = arith.constant 0 : index
    %c0_6 = arith.constant 0 : index
    %8 = vector.load %arg4[%c0_5, %c0_6] : memref<1024x128xbf16, #tpu.memory_space<vmem>>, vector<1024x128xbf16>
    %cst_7 = arith.constant dense<0.000000e+00> : vector<8x128xf32>
    %9 = tpu.matmul %7, %8, %cst_7 {dimension_numbers = #tpu.dot_dimension_numbers<[1], [0], [0], [1], [0, 0, 1, 1], [], []>} : vector<8x1024xbf16>, vector<1024x128xbf16>, vector<8x128xf32> -> vector<8x128xf32>
    %c0_8 = arith.constant 0 : index
    %c0_9 = arith.constant 0 : index
    %10 = vector.load %arg5[%c0_8, %c0_9] : memref<1x128xf32, #tpu.memory_space<vmem>>, vector<1x128xf32>
    %11 = vector.broadcast %10 : vector<1x128xf32> to vector<8x128xf32>
    %12 = arith.addf %9, %11 : vector<8x128xf32>
    %c0_10 = arith.constant 0 : index
    %c0_11 = arith.constant 0 : index
    %13 = vector.load %arg6[%c0_10, %c0_11] : memref<8x128xf32, #tpu.memory_space<vmem>>, vector<8x128xf32>
    tpu.vector_store %arg6[%c0_10, %c0_11], %12 {strides = array<i32>} : memref<8x128xf32, #tpu.memory_space<vmem>>, vector<8x128xf32>,
    return
  }
  func.func @transform_0(%arg0: i32) -> (i32, i32) {
    %c0_i32 = arith.constant 0 : i32
    %c0_i32_0 = arith.constant 0 : i32
    return %arg0, %c0_i32 : i32, i32
  }
  func.func @transform_1(%arg0: i32) -> (i32, i32) {
    %c0_i32 = arith.constant 0 : i32
    %c0_i32_0 = arith.constant 0 : i32
    %c0_i32_1 = arith.constant 0 : i32
    return %c0_i32, %c0_i32_0 : i32, i32
  }
  func.func @transform_2(%arg0: i32) -> (i32, i32) {
    %c0_i32 = arith.constant 0 : i32
    %c0_i32_0 = arith.constant 0 : i32
    %c0_i32_1 = arith.constant 0 : i32
    return %c0_i32, %c0_i32_0 : i32, i32
  }
  func.func @transform_3(%arg0: i32) -> (i32, i32) {
    %c0_i32 = arith.constant 0 : i32
    %c0_i32_0 = arith.constant 0 : i32
    %c0_i32_1 = arith.constant 0 : i32
    return %c0_i32, %c0_i32_0 : i32, i32
  }
  func.func @transform_4(%arg0: i32) -> (i32, i32) {
    %c0_i32 = arith.constant 0 : i32
    %c0_i32_0 = arith.constant 0 : i32
    %c0_i32_1 = arith.constant 0 : i32
    return %c0_i32, %c0_i32_0 : i32, i32
  }
  func.func @transform_5(%arg0: i32) -> (i32, i32) {
    %c0_i32 = arith.constant 0 : i32
    %c0_i32_0 = arith.constant 0 : i32
    return %arg0, %c0_i32 : i32, i32
  }
}

</mosaic_0001>

<bundles_post_ra>
// kernel: forward.1
= control target key start
LH: loop header
LB: loop body
LE: loop exit
PB: predicated region body
PF: predicated region fallthrough
CT: control target
= control target key end

     0   :  { %10 = vsyncpa [#allocation3], 0  ;;  %s1775_s0 = inlined_call_operand.vmem [shape: bf16[8,128], index: 0, kind: input, shape index: {}]   ;;  %s1776_s1 = inlined_call_operand.hbm [shape: bf16[128,1024], index: 1, kind: input, shape index: {}]   ;;  %s1777_s2 = inlined_call_operand.vmem [shape: f32[1,1024], index: 2, kind: input, shape index: {}]   ;;  %s1778_s3 = inlined_call_operand.hbm [shape: bf16[1024,128], index: 3, kind: input, shape index: {}]   ;;  %s1779_s4 = inlined_call_operand.vmem [shape: f32[1,128], index: 4, kind: input, shape index: {}]   ;;  %s1780_s5 = inlined_call_operand.vmem [shape: f32[8,128], index: 5, kind: output, shape index: {}]  }
   0x1   :  { %11 = vsyncpa [#allocation5], 0  ;;  %s1690_s18 = smov [#allocation2]  }
   0x2   :  { %s19_s19 = sshll.u32 %s1690_s18, 4  ;;  %s20_s19 = int_to_ptr.vmem [resolvable:$true] %s19_s19 }
   0x3   :  { %s1654_s20 = scalar_lea.vmem %s20_s19, 8192  ;;  %p1659_p1 = scmp.lt.s32.totalorder %s20_s19, %s20_s19 }
   0x4   :  { %p1655_p0 = scmp.ne.s32.totalorder %s20_s19, %s1654_s20  ;;  %p1660_p2 = scmp.lt.s32.totalorder %s1654_s20, %s1654_s20 }
   0x6   :  { %p1661_p3 = por %p1660_p2, %p1659_p1 }
   0x8   :  { %p1662_p4 = pnand %p1661_p3, %p1655_p0 }
   0xa   :  { %1665 = shalt.err (!%p1662_p4)
}
   0xb   :  { %s1691_s21 = smov 512   ;;  %s1692_s22 = smov 32  }
   0xc   :  { %25 = dma.hbm_to_vmem [thread:$0]  %s1776_s1, 8192, %s20_s19, [#allocation3], %s1691_s21, %s1691_s21, %s1692_s22  }
   0xd   :  { %s1693_s25 = smov [#allocation4]  }
   0xe   :  { %s33_s26 = sshll.u32 %s1693_s25, 4  ;;  %s34_s26 = int_to_ptr.vmem [resolvable:$true] %s33_s26 }
   0xf   :  { %s1674_s27 = scalar_lea.vmem %s34_s26, 8192  ;;  %p1679_p6 = scmp.lt.s32.totalorder %s34_s26, %s34_s26 }
  0x10   :  { %p1675_p5 = scmp.ne.s32.totalorder %s34_s26, %s1674_s27  ;;  %p1680_p7 = scmp.lt.s32.totalorder %s1674_s27, %s1674_s27 }
  0x12   :  { %p1681_p8 = por %p1680_p7, %p1679_p6 }
  0x14   :  { %p1682_p9 = pnand %p1681_p8, %p1675_p5 }
  0x16   :  { %1685 = shalt.err (!%p1682_p9)
}
  0x17   :  { %s1694_s28 = smov 64   ;;  %s1695_s29 = smov 4  }
  0x18   :  { %39 = dma.hbm_to_vmem [thread:$0]  %s1778_s3, 8192, %s34_s26, [#allocation5], %s1694_s28, %s1694_s28, %s1695_s29  }
  0x19   :  { %1686 = dma.done.wait [#allocation3], 8192  }
  0x1a   :  { %1687 = vsyncadd [#allocation3], 4294959104 }
  0x1b   :  { %1688 = dma.done.wait [#allocation5], 8192  }
  0x1c   :  { %1689 = vsyncadd [#allocation5], 4294959104  ;;  %v1696_v0 = vmov 0   ;;  %v106_v1 = vld [vmem:[#allocation2 + $0x1c0] sm:$0xff]  ;;  %v107_v3 = vld [vmem:[#allocation2 + $0x1c8] sm:$0xff] }
  0x1d   :  { %508 = vmatprep.mubr.bf16.mxu0 %v1696_v0  ;;  %549 = vmatprep.mubr.bf16.mxu1 %v1696_v0  ;;  %v110_v2 = vld [vmem:[#allocation2 + $0x1e0] sm:$0xff]  ;;  %v111_v5 = vld [vmem:[#allocation2 + $0x1e8] sm:$0xff]  ;;  %v108_v60 = vld [vmem:[#allocation2 + $0x1d0] sm:$0xff] }
  0x1e   :  { %v1399_v4 = vcombine.high %v106_v1, %v110_v2  ;;  %v1398_v6 = vcombine.low %v106_v1, %v110_v2  ;;  %v98_v7 = vld [vmem:[#allocation2 + $0x180] sm:$0xff]  ;;  %v1401_v9 = vcombine.high %v107_v3, %v111_v5  ;;  %v1400_v10 = vcombine.low %v107_v3, %v111_v5  ;;  %v99_v12 = vld [vmem:[#allocation2 + $0x188] sm:$0xff]  ;;  %v112_v63 = vld [vmem:[#allocation2 + $0x1f0] sm:$0xff] }
  0x1f   :  { %v102_v8 = vld [vmem:[#allocation2 + $0x1a0] sm:$0xff]  ;;  %v103_v13 = vld [vmem:[#allocation2 + $0x1a8] sm:$0xff]  ;;  %v109_v2 = vld [vmem:[#allocation2 + $0x1d8] sm:$0xff] }
  0x20   :  { %v1391_v11 = vcombine.high %v98_v7, %v102_v8  ;;  %v90_v14 = vld [vmem:[#allocation2 + $0x140] sm:$0xff]  ;;  %476 = vmatprep.subr.bf16.mxu0 %v1399_v4  ;;  %v1393_v15 = vcombine.high %v99_v12, %v103_v13  ;;  %v91_v17 = vld [vmem:[#allocation2 + $0x148] sm:$0xff]  ;;  %517 = vmatprep.subr.bf16.mxu1 %v1401_v9  ;;  %v1390_v19 = vcombine.low %v98_v7, %v102_v8  ;;  %v113_v3 = vld [vmem:[#allocation2 + $0x1f8] sm:$0xff] }
  0x21   :  { %v94_v16 = vld [vmem:[#allocation2 + $0x160] sm:$0xff]  ;;  %v95_v18 = vld [vmem:[#allocation2 + $0x168] sm:$0xff]  ;;  %477 = vmatpush1.bf16.msra.mxu0 %v1398_v6  ;;  %518 = vmatpush1.bf16.msra.mxu1 %v1400_v10  ;;  %v1392_v20 = vcombine.low %v99_v12, %v103_v13  ;;  %v1403_v6 = vcombine.high %v108_v60, %v112_v63  ;;  %v100_v7 = vld [vmem:[#allocation2 + $0x190] sm:$0xff]  ;;  %v1405_v9 = vcombine.high %v109_v2, %v113_v3 }
  0x22   :  { %478 = vmatprep.subr.bf16.mxu0 %v1391_v11  ;;  %v1383_v21 = vcombine.high %v90_v14, %v94_v16  ;;  %519 = vmatprep.subr.bf16.mxu1 %v1393_v15  ;;  %v1385_v22 = vcombine.high %v91_v17, %v95_v18  ;;  %v82_v23 = vld [vmem:[#allocation2 + $0x100] sm:$0xff]  ;;  %v83_v25 = vld [vmem:[#allocation2 + $0x108] sm:$0xff]  ;;  %v1382_v27 = vcombine.low %v90_v14, %v94_v16  ;;  %v104_v10 = vld [vmem:[#allocation2 + $0x1b0] sm:$0xff] }
  0x23   :  { %v86_v24 = vld [vmem:[#allocation2 + $0x120] sm:$0xff]  ;;  %v87_v26 = vld [vmem:[#allocation2 + $0x128] sm:$0xff]  ;;  %v1384_v28 = vcombine.low %v91_v17, %v95_v18  ;;  %v101_v11 = vld [vmem:[#allocation2 + $0x198] sm:$0xff]  ;;  %v1402_v13 = vcombine.low %v108_v60, %v112_v63  ;;  %v1404_v16 = vcombine.low %v109_v2, %v113_v3  ;;  %v1395_v17 = vcombine.high %v100_v7, %v104_v10 }
  0x24   :  { %v1375_v29 = vcombine.high %v82_v23, %v86_v24  ;;  %v1377_v30 = vcombine.high %v83_v25, %v87_v26  ;;  %v74_v31 = vld [vmem:[#allocation2 + $0xc0] sm:$0xff]  ;;  %v75_v33 = vld [vmem:[#allocation2 + $0xc8] sm:$0xff]  ;;  %v1374_v35 = vcombine.low %v82_v23, %v86_v24  ;;  %v1376_v36 = vcombine.low %v83_v25, %v87_v26  ;;  %v105_v12 = vld [vmem:[#allocation2 + $0x1b8] sm:$0xff] }
  0x25   :  { %479 = vmatpush1.bf16.msra.mxu0 %v1390_v19  ;;  %520 = vmatpush1.bf16.msra.mxu1 %v1392_v20  ;;  %v78_v32 = vld [vmem:[#allocation2 + $0xe0] sm:$0xff]  ;;  %v79_v34 = vld [vmem:[#allocation2 + $0xe8] sm:$0xff]  ;;  %v92_v14 = vld [vmem:[#allocation2 + $0x150] sm:$0xff]  ;;  %v1397_v20 = vcombine.high %v101_v11, %v105_v12  ;;  %v1396_v24 = vcombine.low %v101_v11, %v105_v12 }
  0x26   :  { %480 = vmatprep.subr.bf16.mxu0 %v1383_v21  ;;  %521 = vmatprep.subr.bf16.mxu1 %v1385_v22  ;;  %v1367_v37 = vcombine.high %v74_v31, %v78_v32  ;;  %v1369_v38 = vcombine.high %v75_v33, %v79_v34  ;;  %v66_v39 = vld [vmem:[#allocation2 + $0x80] sm:$0xff]  ;;  %v67_v41 = vld [vmem:[#allocation2 + $0x88] sm:$0xff]  ;;  %v1366_v43 = vcombine.low %v74_v31, %v78_v32  ;;  %v96_v15 = vld [vmem:[#allocation2 + $0x170] sm:$0xff] }
  0x27   :  { %v70_v40 = vld [vmem:[#allocation2 + $0xa0] sm:$0xff]  ;;  %v71_v42 = vld [vmem:[#allocation2 + $0xa8] sm:$0xff]  ;;  %v1368_v44 = vcombine.low %v75_v33, %v79_v34  ;;  %v93_v18 = vld [vmem:[#allocation2 + $0x158] sm:$0xff]  ;;  %v1394_v21 = vcombine.low %v100_v7, %v104_v10  ;;  %v1387_v25 = vcombine.high %v92_v14, %v96_v15 }
  0x28   :  { %v1359_v45 = vcombine.high %v66_v39, %v70_v40  ;;  %v1361_v46 = vcombine.high %v67_v41, %v71_v42  ;;  %v58_v47 = vld [vmem:[#allocation2 + $0x40] sm:$0xff]  ;;  %v59_v49 = vld [vmem:[#allocation2 + $0x48] sm:$0xff]  ;;  %v1358_v51 = vcombine.low %v66_v39, %v70_v40  ;;  %v1360_v52 = vcombine.low %v67_v41, %v71_v42  ;;  %v97_v19 = vld [vmem:[#allocation2 + $0x178] sm:$0xff] }
  0x29   :  { %481 = vmatpush1.bf16.msra.mxu0 %v1382_v27  ;;  %522 = vmatpush1.bf16.msra.mxu1 %v1384_v28  ;;  %v62_v48 = vld [vmem:[#allocation2 + $0x60] sm:$0xff]  ;;  %v63_v50 = vld [vmem:[#allocation2 + $0x68] sm:$0xff]  ;;  %v84_v22 = vld [vmem:[#allocation2 + $0x110] sm:$0xff]  ;;  %v1389_v28 = vcombine.high %v93_v18, %v97_v19  ;;  %v1388_v32 = vcombine.low %v93_v18, %v97_v19 }
  0x2a   :  { %482 = vmatprep.subr.bf16.mxu0 %v1375_v29  ;;  %523 = vmatprep.subr.bf16.mxu1 %v1377_v30  ;;  %v1351_v53 = vcombine.high %v58_v47, %v62_v48  ;;  %v50_v54 = vld [vmem:[#allocation2] sm:$0xff]  ;;  %v1353_v56 = vcombine.high %v59_v49, %v63_v50  ;;  %v51_v57 = vld [vmem:[#allocation2 + $0x8] sm:$0xff]  ;;  %v1350_v59 = vcombine.low %v58_v47, %v62_v48  ;;  %v88_v23 = vld [vmem:[#allocation2 + $0x130] sm:$0xff] }
  0x2b   :  { %v54_v55 = vld [vmem:[#allocation2 + $0x20] sm:$0xff]  ;;  %v55_v58 = vld [vmem:[#allocation2 + $0x28] sm:$0xff]  ;;  %v1352_v61 = vcombine.low %v59_v49, %v63_v50  ;;  %v85_v26 = vld [vmem:[#allocation2 + $0x118] sm:$0xff]  ;;  %v1386_v29 = vcombine.low %v92_v14, %v96_v15  ;;  %v1379_v33 = vcombine.high %v84_v22, %v88_v23 }
  0x2c   :  { %v1343_v62 = vcombine.high %v50_v54, %v54_v55  ;;  %v1345_v1 = vcombine.high %v51_v57, %v55_v58  ;;  %v1342_v4 = vcombine.low %v50_v54, %v54_v55  ;;  %v1344_v5 = vcombine.low %v51_v57, %v55_v58  ;;  %v1738_v8 = vld [vmem:[%s1775_s0] sm:$0xf]  ;;  %v89_v27 = vld [vmem:[#allocation2 + $0x138] sm:$0xff]  ;;  %v76_v30 = vld [vmem:[#allocation2 + $0xd0] sm:$0xff] }
  0x2d   :  { %483 = vmatpush1.bf16.msra.mxu0 %v1374_v35  ;;  %524 = vmatpush1.bf16.msra.mxu1 %v1376_v36  ;;  %v80_v31 = vld [vmem:[#allocation2 + $0xf0] sm:$0xff]  ;;  %v77_v34 = vld [vmem:[#allocation2 + $0xd8] sm:$0xff]  ;;  %v1381_v36 = vcombine.high %v85_v26, %v89_v27  ;;  %v1380_v40 = vcombine.low %v85_v26, %v89_v27  ;;  %v1574_v12 = vld [vmem:[#allocation4 + $0x68] sm:$0xff]  }
  0x2e   :  { %484 = vmatprep.subr.bf16.mxu0 %v1367_v37  ;;  %525 = vmatprep.subr.bf16.mxu1 %v1369_v38  ;;  %v81_v35 = vld [vmem:[#allocation2 + $0xf8] sm:$0xff]  ;;  %v1378_v37 = vcombine.low %v84_v22, %v88_v23  ;;  %v68_v38 = vld [vmem:[#allocation2 + $0x90] sm:$0xff]  ;;  %v1576_v14 = vld [vmem:[#allocation4 + $0x28] sm:$0xff]  }
  0x2f   :  { %v72_v39 = vld [vmem:[#allocation2 + $0xb0] sm:$0xff]  ;;  %v69_v41 = vld [vmem:[#allocation2 + $0x98] sm:$0xff]  ;;  %v1372_v47 = vcombine.low %v77_v34, %v81_v35  ;;  %v1577_v15 = vld [vmem:[#allocation4 + $0xa8] sm:$0xff]  }
  0x30   :  { %v73_v42 = vld [vmem:[#allocation2 + $0xb8] sm:$0xff]  ;;  %v1363_v48 = vcombine.high %v68_v38, %v72_v39  ;;  %v56_v54 = vld [vmem:[#allocation2 + $0x30] sm:$0xff]  ;;  %v1580_v18 = vld [vmem:[#allocation4 + $0x20] sm:$0xff]  }
  0x31   :  { %485 = vmatpush1.bf16.msra.mxu0 %v1366_v43  ;;  %526 = vmatpush1.bf16.msra.mxu1 %v1368_v44  ;;  %v1373_v43 = vcombine.high %v77_v34, %v81_v35  ;;  %v1370_v44 = vcombine.low %v76_v30, %v80_v31  ;;  %v61_v49 = vld [vmem:[#allocation2 + $0x58] sm:$0xff]  ;;  %v1364_v55 = vcombine.low %v69_v41, %v73_v42  ;;  %v1570_v7 = vld [vmem:[#allocation4 + $0x70] sm:$0xff]   ;;  %v1590_v27 = vld [vmem:[#allocation4 + $0x48] sm:$0xff]  }
  0x32   :  { %486 = vmatprep.subr.bf16.mxu0 %v1359_v45  ;;  %527 = vmatprep.subr.bf16.mxu1 %v1361_v46  ;;  %v60_v45 = vld [vmem:[#allocation2 + $0x50] sm:$0xff]  ;;  %v65_v50 = vld [vmem:[#allocation2 + $0x78] sm:$0xff]  ;;  %v1597_v34 = vld [vmem:[#allocation4 + $0x80] sm:$0xff]  }
  0x33   :  { %v64_v46 = vld [vmem:[#allocation2 + $0x70] sm:$0xff]  ;;  %v53_v57 = vld [vmem:[#allocation2 + $0x18] sm:$0xff] }
  0x34   :  { %v57_v58 = vld [vmem:[#allocation2 + $0x38] sm:$0xff]  ;;  %v1354_v60 = vcombine.low %v60_v45, %v64_v46  ;;  %v1572_v10 = vld [vmem:[#allocation4 + $0x30] sm:$0xff]  }
  0x35   :  { %487 = vmatpush1.bf16.msra.mxu0 %v1358_v51  ;;  %528 = vmatpush1.bf16.msra.mxu1 %v1360_v52  ;;  %v1365_v51 = vcombine.high %v69_v41, %v73_v42  ;;  %v1362_v52 = vcombine.low %v68_v38, %v72_v39  ;;  %v1349_v63 = vcombine.high %v53_v57, %v57_v58  ;;  %v1567_v3 = vld [vmem:[#allocation4 + $0xf8] sm:$0xff]   ;;  %v1573_v11 = vld [vmem:[#allocation4 + $0xb0] sm:$0xff]  }
  0x36   :  { %488 = vmatprep.subr.bf16.mxu0 %v1351_v53  ;;  %529 = vmatprep.subr.bf16.mxu1 %v1353_v56  ;;  %v52_v53 = vld [vmem:[#allocation2 + $0x10] sm:$0xff]  ;;  %v1355_v56 = vcombine.high %v60_v45, %v64_v46  ;;  %v1582_v19 = vld [vmem:[#allocation4 + $0x58] sm:$0xff]  }
  0x37   :  { %v1346_v2 = vcombine.low %v52_v53, %v56_v54  ;;  %v1585_v22 = vld [vmem:[#allocation4 + $0x98] sm:$0xff]   ;;  %v1586_v23 = vld [vmem:[#allocation4 + $0x50] sm:$0xff]  }
  0x38   :  { %v1589_v26 = vld [vmem:[#allocation4 + $0x90] sm:$0xff]   ;;  %v1598_v35 = vld [vmem:[#allocation4 + $0x178] sm:$0xff]  }
  0x39   :  { %489 = vmatpush1.bf16.msra.mxu0 %v1350_v59  ;;  %530 = vmatpush1.bf16.msra.mxu1 %v1352_v61  ;;  %v1357_v59 = vcombine.high %v61_v49, %v65_v50  ;;  %v1356_v61 = vcombine.low %v61_v49, %v65_v50 }
  0x3a   :  { %490 = vmatprep.subr.bf16.mxu0 %v1343_v62  ;;  %531 = vmatprep.subr.bf16.mxu1 %v1345_v1  ;;  %v1347_v62 = vcombine.high %v52_v53, %v56_v54  ;;  %v1566_v1 = vld [vmem:[#allocation4 + $0x78] sm:$0xff]  }
  0x3d   :  { %491 = vmatpush1.bf16.msra.mxu0 %v1342_v4  ;;  %532 = vmatpush1.bf16.msra.mxu1 %v1344_v5  ;;  %v1348_v4 = vcombine.low %v53_v57, %v57_v58  ;;  %v1568_v5 = vld [vmem:[#allocation4 + $0x38] sm:$0xff]  }
  0x3e   :  { %558 = vmatprep.subr.bf16.mxu0 %v1403_v6  ;;  %599 = vmatprep.subr.bf16.mxu1 %v1405_v9  ;;  %v1569_v6 = vld [vmem:[#allocation4 + $0xb8] sm:$0xff]   ;;  %v1571_v9 = vld [vmem:[#allocation4 + $0xf0] sm:$0xff]  }
  0x40   :  { %509 = vmatmul.mubr.bf16.vlgmr.msra.gmra.mxu0 %v1738_v8  ;;  %550 = vmatmul.mubr.bf16.vlgmr.msra.gmra.mxu1 %v1738_v8 }
  0x41   :  { %559 = vmatpush1.bf16.msra.mxu0 %v1402_v13  ;;  %600 = vmatpush1.bf16.msra.mxu1 %v1404_v16  ;;  %v1575_v13 = vld [vmem:[#allocation4 + $0xe8] sm:$0xff]   ;;  %v1578_v16 = vld [vmem:[#allocation4 + $0x60] sm:$0xff]  }
  0x42   :  { %560 = vmatprep.subr.bf16.mxu0 %v1395_v17  ;;  %601 = vmatprep.subr.bf16.mxu1 %v1397_v20  ;;  %v1579_v17 = vld [vmem:[#allocation4 + $0xe0] sm:$0xff]   ;;  %v1583_v20 = vld [vmem:[#allocation4 + $0xd8] sm:$0xff]  }
  0x43   :  { %590 = vmatprep.mubr.bf16.mxu0 %v1696_v0  ;;  %631 = vmatprep.mubr.bf16.mxu1 %v1696_v0  ;;  %v1371_v0 = vcombine.high %v76_v30, %v80_v31  ;;  %v1593_v30 = vld [vmem:[#allocation4 + $0x88] sm:$0xff]   ;;  %v1594_v31 = vld [vmem:[#allocation4 + $0x40] sm:$0xff]  }
  0x45   :  { %561 = vmatpush1.bf16.msra.mxu0 %v1394_v21  ;;  %602 = vmatpush1.bf16.msra.mxu1 %v1396_v24  ;;  %v1584_v21 = vld [vmem:[#allocation4 + $0x18] sm:$0xff]   ;;  %v1587_v24 = vld [vmem:[#allocation4 + $0xd0] sm:$0xff]  }
  0x46   :  { %562 = vmatprep.subr.bf16.mxu0 %v1387_v25  ;;  %603 = vmatprep.subr.bf16.mxu1 %v1389_v28  ;;  %v1588_v25 = vld [vmem:[#allocation4 + $0x10] sm:$0xff]   ;;  %v1591_v28 = vld [vmem:[#allocation4 + $0xc8] sm:$0xff]  }
  0x49   :  { %563 = vmatpush1.bf16.msra.mxu0 %v1386_v29  ;;  %604 = vmatpush1.bf16.msra.mxu1 %v1388_v32  ;;  %v1592_v29 = vld [vmem:[#allocation4 + $0x8] sm:$0xff]   ;;  %v1595_v32 = vld [vmem:[#allocation4 + $0xc0] sm:$0xff]  }
  0x4a   :  { %564 = vmatprep.subr.bf16.mxu0 %v1379_v33  ;;  %605 = vmatprep.subr.bf16.mxu1 %v1381_v36  ;;  %v1596_v33 = vld [vmem:[#allocation4] sm:$0xff]   ;;  %v1599_v36 = vld [vmem:[#allocation4 + $0x1f8] sm:$0xff]  }
  0x4d   :  { %565 = vmatpush1.bf16.msra.mxu0 %v1378_v37  ;;  %606 = vmatpush1.bf16.msra.mxu1 %v1380_v40  ;;  %v116_v37 = vlaneseq  ;;  %v1752_v40 = vld [vmem:[%s1777_s2] sm:$0xff] }
  0x4e   :  { %566 = vmatprep.subr.bf16.mxu0 %v1371_v0  ;;  %607 = vmatprep.subr.bf16.mxu1 %v1373_v43 }
  0x4f   :  { %v1746_v38 = vshrl.u32 %v116_v37, 7 }
  0x51   :  { %567 = vmatpush1.bf16.msra.mxu0 %v1370_v44  ;;  %608 = vmatpush1.bf16.msra.mxu1 %v1372_v47  ;;  %v118_v39 = vsub.s32 0, %v1746_v38  ;;  %v126_v0 = vsub.s32 2, %v1746_v38  ;;  %v122_v41 = vsub.s32 1, %v1746_v38  ;;  %v130_v42 = vsub.s32 3, %v1746_v38 }
  0x52   :  { %568 = vmatprep.subr.bf16.mxu0 %v1363_v48  ;;  %609 = vmatprep.subr.bf16.mxu1 %v1365_v51 }
  0x53   :  { %v119_v43 = vrot.slane %v1752_v40, %v118_v39  ;;  %v127_v44 = vrot.slane %v1752_v40, %v126_v0  ;;  %v123_v45 = vrot.slane %v1752_v40, %v122_v41  ;;  %v131_v47 = vrot.slane %v1752_v40, %v130_v42  ;;  %v1616_v39 = vld [vmem:[#allocation4 + $0x118] sm:$0xff]   ;;  %v1618_v42 = vld [vmem:[#allocation4 + $0x150] sm:$0xff]  }
  0x54   :  { %v1617_v41 = vld [vmem:[#allocation4 + $0x198] sm:$0xff]  }
  0x55   :  { %569 = vmatpush1.bf16.msra.mxu0 %v1362_v52  ;;  %610 = vmatpush1.bf16.msra.mxu1 %v1364_v55 }
  0x56   :  { %570 = vmatprep.subr.bf16.mxu0 %v1355_v56  ;;  %611 = vmatprep.subr.bf16.mxu1 %v1357_v59 }
  0x59   :  { %571 = vmatpush1.bf16.msra.mxu0 %v1354_v60  ;;  %612 = vmatpush1.bf16.msra.mxu1 %v1356_v61 }
  0x5a   :  { %572 = vmatprep.subr.bf16.mxu0 %v1347_v62  ;;  %613 = vmatprep.subr.bf16.mxu1 %v1349_v63 }
  0x5d   :  { %573 = vmatpush1.bf16.msra.mxu0 %v1346_v2  ;;  %614 = vmatpush1.bf16.msra.mxu1 %v1348_v4  ;;  %v1600_v2 = vld [vmem:[#allocation4 + $0x138] sm:$0xff]  }
  0x5e   :  { %1471 = vmatprep.subr.bf16.mxu0 %v1566_v1  ;;  %1493 = vmatprep.subr.bf16.mxu1 %v1567_v3  ;;  %v1601_v4 = vld [vmem:[#allocation4 + $0x1b8] sm:$0xff]  }
  0x60   :  { %591 = vmatmul.mubr.bf16.vlgmr.msra.gmra.mxu0 %v1738_v8  ;;  %632 = vmatmul.mubr.bf16.vlgmr.msra.gmra.mxu1 %v1738_v8  ;;  %v1581_v8 = vld [vmem:[#allocation4 + $0xa0] sm:$0xff]  }
  0x61   :  { %1472 = vmatpush3.bf16.msra.mxu0 %v1568_v5  ;;  %1494 = vmatpush3.bf16.msra.mxu1 %v1569_v6  ;;  %v1602_v5 = vld [vmem:[#allocation4 + $0x170] sm:$0xff]  }
  0x62   :  { %1473 = vmatprep.subr.bf16.mxu0 %v1570_v7  ;;  %1495 = vmatprep.subr.bf16.mxu1 %v1571_v9  ;;  %v1603_v7 = vld [vmem:[#allocation4 + $0x1f0] sm:$0xff]  }
  0x63   :  { %v1604_v9 = vld [vmem:[#allocation4 + $0x130] sm:$0xff]  }
  0x65   :  { %1474 = vmatpush3.bf16.msra.mxu0 %v1572_v10  ;;  %1496 = vmatpush3.bf16.msra.mxu1 %v1573_v11  ;;  %v1605_v10 = vld [vmem:[#allocation4 + $0x1b0] sm:$0xff]   ;;  %v1606_v11 = vld [vmem:[#allocation4 + $0x168] sm:$0xff]  }
  0x66   :  { %1475 = vmatprep.subr.bf16.mxu0 %v1574_v12  ;;  %1497 = vmatprep.subr.bf16.mxu1 %v1575_v13  ;;  %v134_v12 = vsub.s32 4, %v1746_v38  ;;  %v1607_v13 = vld [vmem:[#allocation4 + $0x1e8] sm:$0xff]  }
  0x69   :  { %1476 = vmatpush3.bf16.msra.mxu0 %v1576_v14  ;;  %1498 = vmatpush3.bf16.msra.mxu1 %v1577_v15  ;;  %v142_v14 = vsub.s32 6, %v1746_v38  ;;  %v138_v15 = vsub.s32 5, %v1746_v38 }
  0x6a   :  { %1477 = vmatprep.subr.bf16.mxu0 %v1578_v16  ;;  %1499 = vmatprep.subr.bf16.mxu1 %v1579_v17  ;;  %v1608_v16 = vld [vmem:[#allocation4 + $0x128] sm:$0xff]   ;;  %v146_v17 = vsub.s32 7, %v1746_v38 }
  0x6d   :  { %1478 = vmatpush3.bf16.msra.mxu0 %v1580_v18  ;;  %1500 = vmatpush3.bf16.msra.mxu1 %v1581_v8  ;;  %v135_v18 = vrot.slane %v1752_v40, %v134_v12  ;;  %v1609_v8 = vld [vmem:[#allocation4 + $0x1a8] sm:$0xff]  }
  0x6e   :  { %1479 = vmatprep.subr.bf16.mxu0 %v1582_v19  ;;  %1501 = vmatprep.subr.bf16.mxu1 %v1583_v20  ;;  %v1610_v19 = vld [vmem:[#allocation4 + $0x160] sm:$0xff]   ;;  %v143_v20 = vrot.slane %v1752_v40, %v142_v14 }
  0x71   :  { %1480 = vmatpush3.bf16.msra.mxu0 %v1584_v21  ;;  %1502 = vmatpush3.bf16.msra.mxu1 %v1585_v22  ;;  %v1611_v21 = vld [vmem:[#allocation4 + $0x1e0] sm:$0xff]   ;;  %v139_v22 = vrot.slane %v1752_v40, %v138_v15 }
  0x72   :  { %1481 = vmatprep.subr.bf16.mxu0 %v1586_v23  ;;  %1503 = vmatprep.subr.bf16.mxu1 %v1587_v24  ;;  %v147_v24 = vrot.slane %v1752_v40, %v146_v17 }
  0x75   :  { %1482 = vmatpush3.bf16.msra.mxu0 %v1588_v25  ;;  %1504 = vmatpush3.bf16.msra.mxu1 %v1589_v26  ;;  %v1612_v25 = vld [vmem:[#allocation4 + $0x120] sm:$0xff]  }
  0x76   :  { %1483 = vmatprep.subr.bf16.mxu0 %v1590_v27  ;;  %1505 = vmatprep.subr.bf16.mxu1 %v1591_v28  ;;  %v1613_v28 = vld [vmem:[#allocation4 + $0x1a0] sm:$0xff]  }
  0x79   :  { %1484 = vmatpush3.bf16.msra.mxu0 %v1592_v29  ;;  %1506 = vmatpush3.bf16.msra.mxu1 %v1593_v30  ;;  %v1614_v29 = vld [vmem:[#allocation4 + $0x158] sm:$0xff]  }
  0x7a   :  { %1485 = vmatprep.subr.bf16.mxu0 %v1594_v31  ;;  %1507 = vmatprep.subr.bf16.mxu1 %v1595_v32  ;;  %v1615_v32 = vld [vmem:[#allocation4 + $0x1d8] sm:$0xff]  }
  0x7d   :  { %1486 = vmatpush3.bf16.msra.mxu0 %v1596_v33  ;;  %1508 = vmatpush3.bf16.msra.mxu1 %v1597_v34 }
  0x7e   :  { %1515 = vmatprep.subr.bf16.mxu0 %v1598_v35  ;;  %1537 = vmatprep.subr.bf16.mxu1 %v1599_v36 }
 0x100   :  { %v510_v46 = vpop.f32.mrf.mxu0  ;;  %v551_v49 = vpop.f32.mrf.mxu1 }
 0x101   :  { %v511_v48 = vadd.f32 %v510_v46, %v119_v43  ;;  %v552_v50 = vadd.f32 %v551_v49, %v127_v44  ;;  %v1622_v49 = vld [vmem:[#allocation4 + $0x148] sm:$0xff]  }
 0x102   :  { %v512_v51 = vpop.f32.mrf.mxu0  ;;  %v553_v54 = vpop.f32.mrf.mxu1 }
 0x103   :  { %v640_v52 = vpack.c.bf16 %v511_v48, %v511_v48  ;;  %v513_v53 = vadd.f32 %v512_v51, %v123_v45  ;;  %v642_v55 = vpack.c.bf16 %v552_v50, %v552_v50  ;;  %v554_v56 = vadd.f32 %v553_v54, %v131_v47  ;;  %v1619_v45 = vld [vmem:[#allocation4 + $0x1d0] sm:$0xff]   ;;  %v1623_v50 = vld [vmem:[#allocation4 + $0x1c8] sm:$0xff]   ;;  %v1627_v54 = vld [vmem:[#allocation4 + $0x1c0] sm:$0xff]  }
 0x104   :  { %v514_v57 = vpop.f32.mrf.mxu0  ;;  %v555_v59 = vpop.f32.mrf.mxu1  ;;  %v1620_v47 = vld [vmem:[#allocation4 + $0x110] sm:$0xff]   ;;  %v1624_v51 = vld [vmem:[#allocation4 + $0x108] sm:$0xff]  }
 0x105   :  { %1630 = vtanh.bf16 %v640_v52  ;;  %v641_v58 = vpack.c.bf16 %v513_v53, %v513_v53  ;;  %v643_v60 = vpack.c.bf16 %v554_v56, %v554_v56  ;;  %v1621_v48 = vld [vmem:[#allocation4 + $0x190] sm:$0xff]   ;;  %v1625_v52 = vld [vmem:[#allocation4 + $0x188] sm:$0xff]   ;;  %v1626_v53 = vld [vmem:[#allocation4 + $0x140] sm:$0xff]  }
 0x106   :  { %1632 = vtanh.bf16 %v642_v55  ;;  %v515_v61 = vpop.f32.mrf.mxu0  ;;  %v556_v62 = vpop.f32.mrf.mxu1  ;;  %v1628_v55 = vld [vmem:[#allocation4 + $0x100] sm:$0xff]  }
 0x107   :  { %1634 = vtanh.bf16 %v641_v58  ;;  %v1629_v56 = vld [vmem:[#allocation4 + $0x180] sm:$0xff]  }
 0x108   :  { %1636 = vtanh.bf16 %v643_v60 }
 0x113   :  { %v1631_v63 = vpop.eup %1630 }
 0x114   :  { %v1633_v1 = vpop.eup %1632 }
 0x115   :  { %v1635_v3 = vpop.eup %1634 }
 0x116   :  { %v1637_v6 = vpop.eup %1636  ;;  %1207 = vmatprep.mubr.bf16.mxu0 %v1635_v3 }
 0x117   :  { %1247 = vmatprep.mubr.bf16.mxu1 %v1637_v6  ;;  %1208 = vmatmul.mubr.bf16.vlgmr.msra.gmra.mxu0 %v1631_v63 }
 0x118   :  { %1248 = vmatmul.mubr.bf16.vlgmr.msra.gmra.mxu1 %v1633_v1  ;;  %1516 = vmatpush3.bf16.msra.mxu0 %v1600_v2 }
 0x119   :  { %1538 = vmatpush3.bf16.msra.mxu1 %v1601_v4  ;;  %1517 = vmatprep.subr.bf16.mxu0 %v1602_v5 }
 0x11a   :  { %1539 = vmatprep.subr.bf16.mxu1 %v1603_v7  ;;  %v1406_v7 = vld [vmem:[%s1779_s4] ss:$0 sm:$0xff] }
 0x11c   :  { %1518 = vmatpush3.bf16.msra.mxu0 %v1604_v9 }
 0x11d   :  { %1540 = vmatpush3.bf16.msra.mxu1 %v1605_v10  ;;  %1519 = vmatprep.subr.bf16.mxu0 %v1606_v11 }
 0x11e   :  { %1541 = vmatprep.subr.bf16.mxu1 %v1607_v13 }
 0x120   :  { %v592_v23 = vpop.f32.mrf.mxu0  ;;  %1520 = vmatpush3.bf16.msra.mxu0 %v1608_v16  ;;  %v633_v27 = vpop.f32.mrf.mxu1 }
 0x121   :  { %v593_v26 = vadd.f32 %v592_v23, %v135_v18  ;;  %1542 = vmatpush3.bf16.msra.mxu1 %v1609_v8  ;;  %1521 = vmatprep.subr.bf16.mxu0 %v1610_v19  ;;  %v634_v30 = vadd.f32 %v633_v27, %v143_v20 }
 0x122   :  { %v594_v31 = vpop.f32.mrf.mxu0  ;;  %1543 = vmatprep.subr.bf16.mxu1 %v1611_v21  ;;  %v635_v35 = vpop.f32.mrf.mxu1 }
 0x123   :  { %v644_v33 = vpack.c.bf16 %v593_v26, %v593_v26  ;;  %v595_v34 = vadd.f32 %v594_v31, %v139_v22  ;;  %v646_v36 = vpack.c.bf16 %v634_v30, %v634_v30  ;;  %v636_v37 = vadd.f32 %v635_v35, %v147_v24 }
 0x124   :  { %v596_v38 = vpop.f32.mrf.mxu0  ;;  %1522 = vmatpush3.bf16.msra.mxu0 %v1612_v25  ;;  %v637_v0 = vpop.f32.mrf.mxu1 }
 0x125   :  { %1638 = vtanh.bf16 %v644_v33  ;;  %v645_v40 = vpack.c.bf16 %v595_v34, %v595_v34  ;;  %1544 = vmatpush3.bf16.msra.mxu1 %v1613_v28  ;;  %1523 = vmatprep.subr.bf16.mxu0 %v1614_v29  ;;  %v647_v43 = vpack.c.bf16 %v636_v37, %v636_v37 }
 0x126   :  { %1640 = vtanh.bf16 %v646_v36  ;;  %v597_v44 = vpop.f32.mrf.mxu0  ;;  %1545 = vmatprep.subr.bf16.mxu1 %v1615_v32  ;;  %v638_v46 = vpop.f32.mrf.mxu1 }
 0x127   :  { %1642 = vtanh.bf16 %v645_v40 }
 0x128   :  { %1644 = vtanh.bf16 %v647_v43  ;;  %1524 = vmatpush3.bf16.msra.mxu0 %v1616_v39 }
 0x129   :  { %1546 = vmatpush3.bf16.msra.mxu1 %v1617_v41  ;;  %1525 = vmatprep.subr.bf16.mxu0 %v1618_v42 }
 0x12a   :  { %1547 = vmatprep.subr.bf16.mxu1 %v1619_v45 }
 0x12c   :  { %1526 = vmatpush3.bf16.msra.mxu0 %v1620_v47 }
 0x12d   :  { %1548 = vmatpush3.bf16.msra.mxu1 %v1621_v48  ;;  %1527 = vmatprep.subr.bf16.mxu0 %v1622_v49 }
 0x12e   :  { %1549 = vmatprep.subr.bf16.mxu1 %v1623_v50 }
 0x130   :  { %1528 = vmatpush3.bf16.msra.mxu0 %v1624_v51 }
 0x131   :  { %1550 = vmatpush3.bf16.msra.mxu1 %v1625_v52  ;;  %1529 = vmatprep.subr.bf16.mxu0 %v1626_v53 }
 0x132   :  { %1551 = vmatprep.subr.bf16.mxu1 %v1627_v54 }
 0x133   :  { %v1639_v57 = vpop.eup %1638 }
 0x134   :  { %v1641_v58 = vpop.eup %1640  ;;  %1530 = vmatpush3.bf16.msra.mxu0 %v1628_v55 }
 0x135   :  { %v1643_v59 = vpop.eup %1642  ;;  %1552 = vmatpush3.bf16.msra.mxu1 %v1629_v56 }
 0x136   :  { %v1645_v60 = vpop.eup %1644  ;;  %1287 = vmatprep.mubr.bf16.mxu0 %v1643_v59 }
 0x137   :  { %1327 = vmatprep.mubr.bf16.mxu1 %v1645_v60  ;;  %1288 = vmatmul.mubr.bf16.vlgmr.msra.gmra.mxu0 %v1639_v57 }
 0x138   :  { %1328 = vmatmul.mubr.bf16.vlgmr.msra.gmra.mxu1 %v1641_v58 }
 0x1d7   :  { %v1487_v61 = vpop.f32.mrf.mxu0 }
 0x1d8   :  { %v1509_v62 = vpop.f32.mrf.mxu1 }
 0x1d9   :  { %v1488_v63 = vpop.f32.mrf.mxu0 }
 0x1da   :  { %v1510_v1 = vpop.f32.mrf.mxu1  ;;  %v1489_v6 = vadd.f32 %v1488_v63, %v1487_v61 }
 0x1db   :  { %v1490_v2 = vpop.f32.mrf.mxu0  ;;  %v1511_v11 = vadd.f32 %v1510_v1, %v1509_v62 }
 0x1dc   :  { %v1512_v3 = vpop.f32.mrf.mxu1  ;;  %v1210_v9 = vadd.f32 %v1489_v6, %v1406_v7 }
 0x1dd   :  { %v1491_v4 = vpop.f32.mrf.mxu0 }
 0x1de   :  { %v1513_v5 = vpop.f32.mrf.mxu1  ;;  %v1250_v14 = vadd.f32 %v1511_v11, %v1210_v9 }
 0x1f7   :  { %v1531_v10 = vpop.f32.mrf.mxu0 }
 0x1f8   :  { %v1553_v12 = vpop.f32.mrf.mxu1 }
 0x1f9   :  { %v1532_v13 = vpop.f32.mrf.mxu0 }
 0x1fa   :  { %v1533_v15 = vadd.f32 %v1532_v13, %v1531_v10  ;;  %v1554_v16 = vpop.f32.mrf.mxu1 }
 0x1fb   :  { %v1534_v17 = vpop.f32.mrf.mxu0  ;;  %v1555_v8 = vadd.f32 %v1554_v16, %v1553_v12 }
 0x1fc   :  { %v1290_v18 = vadd.f32 %v1533_v15, %v1250_v14  ;;  %v1556_v19 = vpop.f32.mrf.mxu1 }
 0x1fd   :  { %v1535_v20 = vpop.f32.mrf.mxu0 }
 0x1fe   :  { %v1330_v21 = vadd.f32 %v1555_v8, %v1290_v18  ;;  %v1557_v22 = vpop.f32.mrf.mxu1 }
 0x200   :  { %1335 = vst [vmem:[%s1780_s5] sm:$0xff] %v1330_v21 }
 0x201   :  { %1340 = vsyncpa [#allocation3], 1 }
 0x202   :  { %1341 = vsyncpa [#allocation5], 1 }

</bundles_post_ra>
